<compile_context>
chip_gen: v6e
topology: v6e:2x2x1
jax: 0.10.0
libtpu: 0.0.40
codegen_flags: <defaults>
</compile_context>

<pallas_src>
import jax
import jax.numpy as jnp
from jax.experimental import pallas as pl
from jax.experimental.pallas import tpu as pltpu


def _round_up(n, m):
    return ((n + m - 1) // m) * m


def actor_kernel(x_ref, w1_ref, b1_ref, w2_ref, b2_ref, w3_ref, b3_ref, o_ref):
    # x / W* are bf16 (MXU operands); biases, ReLU and softmax math stay f32
    # (safe on v5e where the VPU/EUP have no bf16 path).
    x = x_ref[...]

    # Linear 1 + ReLU (f32 accumulate on the MXU)
    h1 = jnp.dot(x, w1_ref[...], preferred_element_type=jnp.float32) + b1_ref[...]
    h1 = jnp.maximum(h1, 0.0)

    # Linear 2 + ReLU
    h2 = jnp.dot(h1.astype(jnp.bfloat16), w2_ref[...],
                 preferred_element_type=jnp.float32) + b2_ref[...]
    h2 = jnp.maximum(h2, 0.0)

    # Linear 3 (output lanes padded to a multiple of 128; pad columns of b3 are
    # -1e30 so their softmax probability is exactly 0)
    logits = jnp.dot(h2.astype(jnp.bfloat16), w3_ref[...],
                     preferred_element_type=jnp.float32) + b3_ref[...]

    # Numerically stable softmax along the last axis.
    m = jnp.max(logits, axis=-1, keepdims=True)
    e = jnp.exp(logits - m)
    denom = jnp.sum(e, axis=-1, keepdims=True)
    # Divide -> EUP reciprocal + VPU multiply (EUP slot otherwise idle).
    o_ref[...] = (e * pl.reciprocal(denom, approx=True)).astype(o_ref.dtype)


def prepare_actor_params(params):
    """One-time parameter preparation (hoist bf16 casts / output padding out of the hot path)."""
    w1, b1, w2, b2, w3, b3 = params
    A = w3.shape[1]
    A_pad = _round_up(A, 128)

    # Lane-dense output layer: pad action_dim to a multiple of 128. Pad columns
    # of the bias are -1e30 so exp(logit - max) == 0 on pad lanes (f32 math).
    w3p = jnp.zeros((w3.shape[0], A_pad), jnp.float32).at[:, :A].set(w3)
    b3p = jnp.full((1, A_pad), -1e30, jnp.float32).at[:, :A].set(
        b3.astype(jnp.float32))

    return (
        w1.astype(jnp.bfloat16),
        b1.astype(jnp.float32),
        w2.astype(jnp.bfloat16),
        b2.astype(jnp.float32),
        w3p.astype(jnp.bfloat16),
        b3p,
        int(A),
    )


def actor_forward(x, prepared, *, block_batch=2048, out_dtype=jnp.float32,
                  unpad=True):
    """Fused Actor forward.

    x: (B, state_dim) f32. Returns (B, action_dim) `out_dtype` softmax probs
    (or the padded (B_pad, A_pad) buffer if unpad=False, to skip the extra
    XLA slice pass; pad lanes carry exactly zero probability).
    """
    w1b, b1f, w2b, b2f, w3b, b3p, A = prepared
    B, S = x.shape
    A_pad = w3b.shape[1]

    # ---- batch tiling ----
    # Large tiles amortize the ~0.35us per-grid-step cost, but TB is chosen so
    # the last tile is mostly full (waste < 16 rows), and capped at 4096 rows
    # so f32 intermediates + double-buffered I/O fit v7x's 64 MiB VMEM / TC.
    block_batch = max(16, int(block_batch))
    if B <= block_batch:
        TB = _round_up(B, 16)
    else:
        n_tiles = -(-B // block_batch)
        TB = _round_up(-(-B // n_tiles), 16)
    TB = min(TB, 4096)
    B_pad = _round_up(B, TB)

    xb = x.astype(jnp.bfloat16)
    if B_pad != B:
        xb = jnp.zeros((B_pad, S), jnp.bfloat16).at[:B, :].set(xb)

    grid = (B_pad // TB,)

    out = pl.pallas_call(
        actor_kernel,
        out_shape=jax.ShapeDtypeStruct((B_pad, A_pad), out_dtype),
        grid_spec=pltpu.PrefetchScalarGridSpec(
            num_scalar_prefetch=0,
            grid=grid,
            in_specs=[
                # x: tiled over the batch grid axis (double-buffered DMA).
                pl.BlockSpec((TB, S), lambda i: (i, 0)),
                # Weights / biases: constant block index -> VMEM-resident
                # across all grid steps (fetched once).
                pl.BlockSpec(w1b.shape, lambda i: (0, 0)),
                pl.BlockSpec(b1f.shape, lambda i: (0, 0)),
                pl.BlockSpec(w2b.shape, lambda i: (0, 0)),
                pl.BlockSpec(b2f.shape, lambda i: (0, 0)),
                pl.BlockSpec(w3b.shape, lambda i: (0, 0)),
                pl.BlockSpec(b3p.shape, lambda i: (0, 0)),
            ],
            out_specs=pl.BlockSpec((TB, A_pad), lambda i: (i, 0)),
        ),
        compiler_params=pltpu.CompilerParams(
            dimension_semantics=("parallel",),
            # Above v5e's 16 MiB default scoped limit, below v7x's 64 MiB
            # physical: large TB tiles pipeline without compiler re-tiling.
            vmem_limit_bytes=48 * 1024 * 1024,
        ),
    )(xb, w1b, b1f, w2b, b2f, w3b, b3p)

    if not unpad:
        return out
    # Slice away batch padding and the padded (zero-probability) action lanes.
    return out[:B, :A]


def init_actor_params(key, state_dim, action_dim, hidden_size=128):
    # Mimics PyTorch's default nn.Linear init:
    # uniform(-1/sqrt(fan_in), 1/sqrt(fan_in)) for weights and biases.
    def linear(key, fan_in, fan_out):
        kw, kb = jax.random.split(key)
        bound = 1.0 / jnp.sqrt(jnp.float32(fan_in))
        w = jax.random.uniform(kw, (fan_in, fan_out), jnp.float32, -bound, bound)
        b = jax.random.uniform(kb, (1, fan_out), jnp.float32, -bound, bound)
        return w, b

    k1, k2, k3 = jax.random.split(key, 3)
    w1, b1 = linear(k1, state_dim, hidden_size)
    w2, b2 = linear(k2, hidden_size, hidden_size)
    w3, b3 = linear(k3, hidden_size, action_dim)
    return (w1, b1, w2, b2, w3, b3)


def actor_ref(x, params):
    # Pure-JAX f32 reference.
    w1, b1, w2, b2, w3, b3 = params
    h1 = jnp.maximum(x @ w1 + b1, 0.0)
    h2 = jnp.maximum(h1 @ w2 + b2, 0.0)
    return jax.nn.softmax(h2 @ w3 + b3, axis=-1)


if __name__ == "__main__":
    key = jax.random.PRNGKey(0)
    kx, kp = jax.random.split(key)

    batch, state_dim, action_dim, hidden = 4, 8, 6, 32
    x = jax.random.normal(kx, (batch, state_dim), jnp.float32)
    params = init_actor_params(kp, state_dim, action_dim, hidden_size=hidden)

    # One-time param prep (bf16 casts + output-lane padding), then the kernel.
    prepared = prepare_actor_params(params)
    out = actor_forward(x, prepared)
    out = jax.block_until_ready(out)

    ref = actor_ref(x, params)
    assert out.shape == (batch, action_dim), out.shape
    # bf16 MXU operands + approx reciprocal -> compare with a loose tolerance.
    # TODO(synk): use pl.reciprocal(approx=False) if exact row-normalization is
    # required downstream (e.g. strict Categorical log-prob sums).
    assert jnp.allclose(out, ref, atol=3e-2, rtol=0.0), (out, ref)
    # Rows are valid probability distributions (pad lanes carry zero mass).
    assert jnp.allclose(jnp.sum(out, axis=-1), jnp.ones((batch,)), atol=1e-2)
    assert bool(jnp.all(out >= 0.0))

    # Exercise a multi-tile batch (grid > 1, includes batch padding) as well.
    big_b = 3000
    xb_big = jax.random.normal(kx, (big_b, state_dim), jnp.float32)
    out_big = jax.block_until_ready(actor_forward(xb_big, prepared))
    ref_big = actor_ref(xb_big, params)
    assert out_big.shape == (big_b, action_dim)
    assert jnp.allclose(out_big, ref_big, atol=3e-2, rtol=0.0)

    print("KERNEL_OK")
</pallas_src>

<mosaic_0001>
module attributes {stable_mosaic.version = 11 : i64} {
  func.func @actor_kernel(%arg0: i32, %arg1: memref<16x8xbf16, #tpu.memory_space<vmem>>, %arg2: memref<8x32xbf16, #tpu.memory_space<vmem>>, %arg3: memref<1x32xf32, #tpu.memory_space<vmem>>, %arg4: memref<32x32xbf16, #tpu.memory_space<vmem>>, %arg5: memref<1x32xf32, #tpu.memory_space<vmem>>, %arg6: memref<32x128xbf16, #tpu.memory_space<vmem>>, %arg7: memref<1x128xf32, #tpu.memory_space<vmem>>, %arg8: memref<16x128xf32, #tpu.memory_space<vmem>>) attributes {dimension_semantics = [#tpu.dimension_semantics<parallel>], iteration_bounds = array<i64: 1>, scalar_prefetch = 0 : i64, scratch_operands = 0 : i64, tpu.core_type = #tpu.core_type<tc>, window_params = [{transform_indices = @transform_0, window_bounds = array<i64: 16, 8>}, {pipeline_mode = #tpu.pipeline_mode<synchronous>, transform_indices = @transform_1, window_bounds = array<i64: 8, 32>}, {pipeline_mode = #tpu.pipeline_mode<synchronous>, transform_indices = @transform_2, window_bounds = array<i64: 1, 32>}, {pipeline_mode = #tpu.pipeline_mode<synchronous>, transform_indices = @transform_3, window_bounds = array<i64: 32, 32>}, {pipeline_mode = #tpu.pipeline_mode<synchronous>, transform_indices = @transform_4, window_bounds = array<i64: 1, 32>}, {pipeline_mode = #tpu.pipeline_mode<synchronous>, transform_indices = @transform_5, window_bounds = array<i64: 32, 128>}, {pipeline_mode = #tpu.pipeline_mode<synchronous>, transform_indices = @transform_6, window_bounds = array<i64: 1, 128>}, {transform_indices = @transform_7, window_bounds = array<i64: 16, 128>}]} {
    %c0 = arith.constant 0 : index
    %c0_0 = arith.constant 0 : index
    %0 = vector.load %arg1[%c0, %c0_0] : memref<16x8xbf16, #tpu.memory_space<vmem>>, vector<16x8xbf16>
    %c0_1 = arith.constant 0 : index
    %c0_2 = arith.constant 0 : index
    %1 = vector.load %arg2[%c0_1, %c0_2] : memref<8x32xbf16, #tpu.memory_space<vmem>>, vector<8x32xbf16>
    %cst = arith.constant dense<0.000000e+00> : vector<16x32xf32>
    %2 = tpu.matmul %0, %1, %cst {dimension_numbers = #tpu.dot_dimension_numbers<[1], [0], [0], [1], [0, 0, 1, 1], [], []>} : vector<16x8xbf16>, vector<8x32xbf16>, vector<16x32xf32> -> vector<16x32xf32>
    %c0_3 = arith.constant 0 : index
    %c0_4 = arith.constant 0 : index
    %3 = vector.load %arg3[%c0_3, %c0_4] : memref<1x32xf32, #tpu.memory_space<vmem>>, vector<1x32xf32>
    %4 = vector.broadcast %3 : vector<1x32xf32> to vector<16x32xf32>
    %5 = arith.addf %2, %4 : vector<16x32xf32>
    %cst_5 = arith.constant 0.000000e+00 : f32
    %6 = vector.broadcast %cst_5 : f32 to vector<16x32xf32>
    %7 = arith.maximumf %5, %6 : vector<16x32xf32>
    %8 = arith.truncf %7 : vector<16x32xf32> to vector<16x32xbf16>
    %c0_6 = arith.constant 0 : index
    %c0_7 = arith.constant 0 : index
    %9 = vector.load %arg4[%c0_6, %c0_7] : memref<32x32xbf16, #tpu.memory_space<vmem>>, vector<32x32xbf16>
    %cst_8 = arith.constant dense<0.000000e+00> : vector<16x32xf32>
    %10 = tpu.matmul %8, %9, %cst_8 {dimension_numbers = #tpu.dot_dimension_numbers<[1], [0], [0], [1], [0, 0, 1, 1], [], []>} : vector<16x32xbf16>, vector<32x32xbf16>, vector<16x32xf32> -> vector<16x32xf32>
    %c0_9 = arith.constant 0 : index
    %c0_10 = arith.constant 0 : index
    %11 = vector.load %arg5[%c0_9, %c0_10] : memref<1x32xf32, #tpu.memory_space<vmem>>, vector<1x32xf32>
    %12 = vector.broadcast %11 : vector<1x32xf32> to vector<16x32xf32>
    %13 = arith.addf %10, %12 : vector<16x32xf32>
    %cst_11 = arith.constant 0.000000e+00 : f32
    %14 = vector.broadcast %cst_11 : f32 to vector<16x32xf32>
    %15 = arith.maximumf %13, %14 : vector<16x32xf32>
    %16 = arith.truncf %15 : vector<16x32xf32> to vector<16x32xbf16>
    %c0_12 = arith.constant 0 : index
    %c0_13 = arith.constant 0 : index
    %17 = vector.load %arg6[%c0_12, %c0_13] : memref<32x128xbf16, #tpu.memory_space<vmem>>, vector<32x128xbf16>
    %cst_14 = arith.constant dense<0.000000e+00> : vector<16x128xf32>
    %18 = tpu.matmul %16, %17, %cst_14 {dimension_numbers = #tpu.dot_dimension_numbers<[1], [0], [0], [1], [0, 0, 1, 1], [], []>} : vector<16x32xbf16>, vector<32x128xbf16>, vector<16x128xf32> -> vector<16x128xf32>
    %c0_15 = arith.constant 0 : index
    %c0_16 = arith.constant 0 : index
    %19 = vector.load %arg7[%c0_15, %c0_16] : memref<1x128xf32, #tpu.memory_space<vmem>>, vector<1x128xf32>
    %20 = vector.broadcast %19 : vector<1x128xf32> to vector<16x128xf32>
    %21 = arith.addf %18, %20 : vector<16x128xf32>
    %cst_17 = arith.constant dense<0xFF800000> : vector<16xf32>
    %22 = vector.multi_reduction <maximumf>, %21, %cst_17 [1] : vector<16x128xf32> to vector<16xf32>
    %23 = vector.shape_cast %22 : vector<16xf32> to vector<16x1xf32>
    %24 = vector.broadcast %23 : vector<16x1xf32> to vector<16x128xf32>
    %25 = arith.subf %21, %24 : vector<16x128xf32>
    %26 = math.exp %25 : vector<16x128xf32>
    %cst_18 = arith.constant dense<0.000000e+00> : vector<16xf32>
    %27 = vector.multi_reduction <add>, %26, %cst_18 [1] : vector<16x128xf32> to vector<16xf32>
    %28 = vector.shape_cast %27 : vector<16xf32> to vector<16x1xf32>
    %29 = tpu.reciprocal %28 {approx = true} : vector<16x1xf32> -> vector<16x1xf32>
    %30 = vector.broadcast %29 : vector<16x1xf32> to vector<16x128xf32>
    %31 = arith.mulf %26, %30 : vector<16x128xf32>
    %c0_19 = arith.constant 0 : index
    %c0_20 = arith.constant 0 : index
    %32 = vector.load %arg8[%c0_19, %c0_20] : memref<16x128xf32, #tpu.memory_space<vmem>>, vector<16x128xf32>
    tpu.vector_store %arg8[%c0_19, %c0_20], %31 {strides = array<i32>} : memref<16x128xf32, #tpu.memory_space<vmem>>, vector<16x128xf32>,
    return
  }
  func.func @transform_0(%arg0: i32) -> (i32, i32) {
    %c0_i32 = arith.constant 0 : i32
    %c0_i32_0 = arith.constant 0 : i32
    return %arg0, %c0_i32 : i32, i32
  }
  func.func @transform_1(%arg0: i32) -> (i32, i32) {
    %c0_i32 = arith.constant 0 : i32
    %c0_i32_0 = arith.constant 0 : i32
    %c0_i32_1 = arith.constant 0 : i32
    return %c0_i32, %c0_i32_0 : i32, i32
  }
  func.func @transform_2(%arg0: i32) -> (i32, i32) {
    %c0_i32 = arith.constant 0 : i32
    %c0_i32_0 = arith.constant 0 : i32
    %c0_i32_1 = arith.constant 0 : i32
    return %c0_i32, %c0_i32_0 : i32, i32
  }
  func.func @transform_3(%arg0: i32) -> (i32, i32) {
    %c0_i32 = arith.constant 0 : i32
    %c0_i32_0 = arith.constant 0 : i32
    %c0_i32_1 = arith.constant 0 : i32
    return %c0_i32, %c0_i32_0 : i32, i32
  }
  func.func @transform_4(%arg0: i32) -> (i32, i32) {
    %c0_i32 = arith.constant 0 : i32
    %c0_i32_0 = arith.constant 0 : i32
    %c0_i32_1 = arith.constant 0 : i32
    return %c0_i32, %c0_i32_0 : i32, i32
  }
  func.func @transform_5(%arg0: i32) -> (i32, i32) {
    %c0_i32 = arith.constant 0 : i32
    %c0_i32_0 = arith.constant 0 : i32
    %c0_i32_1 = arith.constant 0 : i32
    return %c0_i32, %c0_i32_0 : i32, i32
  }
  func.func @transform_6(%arg0: i32) -> (i32, i32) {
    %c0_i32 = arith.constant 0 : i32
    %c0_i32_0 = arith.constant 0 : i32
    %c0_i32_1 = arith.constant 0 : i32
    return %c0_i32, %c0_i32_0 : i32, i32
  }
  func.func @transform_7(%arg0: i32) -> (i32, i32) {
    %c0_i32 = arith.constant 0 : i32
    %c0_i32_0 = arith.constant 0 : i32
    return %arg0, %c0_i32 : i32, i32
  }
}

</mosaic_0001>

<bundles_post_ra>
// kernel: tpu_custom_call.1
= control target key start
LH: loop header
LB: loop body
LE: loop exit
PB: predicated region body
PF: predicated region fallthrough
CT: control target
= control target key end

     0   :  { %12 = vsyncpa [#allocation3], 0  ;;  %s504_s0 = inlined_call_operand.vmem [shape: bf16[16,8], index: 0, kind: input, shape index: {}]   ;;  %s505_s1 = inlined_call_operand.hbm [shape: bf16[8,32], index: 1, kind: input, shape index: {}]   ;;  %s506_s2 = inlined_call_operand.vmem [shape: f32[1,32], index: 2, kind: input, shape index: {}]   ;;  %s507_s3 = inlined_call_operand.vmem [shape: bf16[32,32], index: 3, kind: input, shape index: {}]   ;;  %s508_s4 = inlined_call_operand.vmem [shape: f32[1,32], index: 4, kind: input, shape index: {}]   ;;  %s509_s5 = inlined_call_operand.hbm [shape: bf16[32,128], index: 5, kind: input, shape index: {}]   ;;  %s510_s6 = inlined_call_operand.vmem [shape: f32[1,128], index: 6, kind: input, shape index: {}]   ;;  %s511_s7 = inlined_call_operand.hbm [shape: f32[16,128], index: 7, kind: output, shape index: {}]  }
   0x1   :  { %13 = vsyncpa [#allocation6], 0 }
   0x2   :  { %14 = vsyncpa [#allocation4], 0  ;;  %s426_s24 = smov [#allocation2]   ;;  %s427_s26 = smov [#allocation5]  }
   0x3   :  { %s23_s25 = sshll.u32 %s426_s24, 4  ;;  %s38_s27 = sshll.u32 %s427_s26, 4  ;;  %s24_s25 = int_to_ptr.vmem [resolvable:$true] %s23_s25  ;;  %s39_s27 = int_to_ptr.vmem [resolvable:$true] %s38_s27 }
   0x4   :  { %s368_s28 = scalar_lea.vmem %s24_s25, 64  ;;  %p373_p1 = scmp.lt.s32.totalorder %s24_s25, %s24_s25 }
   0x5   :  { %p369_p0 = scmp.ne.s32.totalorder %s24_s25, %s368_s28  ;;  %p374_p2 = scmp.lt.s32.totalorder %s368_s28, %s368_s28 }
   0x7   :  { %p375_p3 = por %p374_p2, %p373_p1 }
   0x9   :  { %p376_p4 = pnand %p375_p3, %p369_p0 }
   0xb   :  { %379 = shalt.err (!%p376_p4)
}
   0xc   :  { %26 = dma.hbm_to_vmem [thread:$0]  %s505_s1, 64, %s24_s25, [#allocation3]  }
   0xd   :  { %s388_s8 = scalar_lea.vmem %s39_s27, 256  ;;  %p393_p6 = scmp.lt.s32.totalorder %s39_s27, %s39_s27 }
   0xe   :  { %p389_p5 = scmp.ne.s32.totalorder %s39_s27, %s388_s8  ;;  %p394_p7 = scmp.lt.s32.totalorder %s388_s8, %s388_s8 }
  0x10   :  { %p395_p8 = por %p394_p7, %p393_p6 }
  0x12   :  { %p396_p9 = pnand %p395_p8, %p389_p5 }
  0x14   :  { %399 = shalt.err (!%p396_p9)
}
  0x15   :  { %s428_s9 = smov 64   ;;  %s429_s10 = smov 4  }
  0x16   :  { %44 = dma.hbm_to_vmem [thread:$0]  %s509_s5, 256, %s39_s27, [#allocation6], %s428_s9, %s428_s9, %s429_s10  }
  0x17   :  { %420 = dma.done.wait [#allocation3], 64  }
  0x18   :  { %421 = vsyncadd [#allocation3], 4294967232 }
  0x19   :  { %422 = dma.done.wait [#allocation6], 256  }
  0x1a   :  { %423 = vsyncadd [#allocation6], 4294967040  ;;  %v430_v0 = vmov 0.0   ;;  %vm431_vm0 = vmmov 0   ;;  %vm73_vm1 = vcmask 1043456   ;;  %v347_v3 = vld [vmem:[%s504_s0] sm:$0xff]  }
  0x1b   :  { %316 = vmatprep.subr.bf16.mxu0 %v430_v0  ;;  %318 = vmatprep.mubr.msk.bf16.mxu0 %vm431_vm0, %v430_v0  ;;  %v56_v1 = vld [vmem:[#allocation2] sm:$0xf]  ;;  %vm69_vm2 = vcmask 64512   ;;  %v348_v4 = vld [vmem:[%s507_s3 + $0x8] sm:$0xff]   ;;  %vm144_vm3 = vcmask 261120  }
  0x1c   :  { %322 = vmatprep.subr.bf16.mxu1 %v430_v0  ;;  %326 = vmatprep.mubr.msk.bf16.mxu1 %vm431_vm0, %v430_v0  ;;  %v75_v2 = vsel %vm73_vm1, %v56_v1, 0  ;;  %v349_v5 = vld [vmem:[%s507_s3] sm:$0xff]   ;;  %v350_v16 = vld [vmem:[#allocation5 + $0x8] sm:$0xff]  }
  0x1d   :  { %317 = vmatpush3.bf16.msra.mxu0 %v75_v2  ;;  %323 = vmatpush3.bf16.msra.mxu1 %v348_v4  ;;  %v297_v6 = vld [vmem:[%s506_s2] ss:$0 sm:$0xff]  ;;  %v351_v17 = vld [vmem:[#allocation5] sm:$0xff]  }
  0x1e   :  { %330 = vmatprep.subr.bf16.mxu0 %v430_v0  ;;  %324 = vmatprep.subr.bf16.mxu1 %v430_v0  ;;  %v300_v18 = vld [vmem:[%s508_s4] ss:$0 sm:$0xff]  ;;  %s432_s4 = smov [#allocation7]  }
  0x1f   :  { %v304_v28 = vld [vmem:[%s510_s6] ss:$0 sm:$0xff]  ;;  %s284_s6 = sshll.u32 %s432_s4, 4  ;;  %s285_s6 = int_to_ptr.vmem [resolvable:$true] %s284_s6 }
  0x20   :  { %319 = vmatmul.mubr.msk.bf16.vlgmr.msra.gmra.mxu0 %vm69_vm2, %v347_v3  ;;  %s400_s20 = scalar_lea.vmem %s285_s6, 256  ;;  %p405_p11 = scmp.lt.s32.totalorder %s285_s6, %s285_s6 }
  0x21   :  { %334 = vmatprep.mubr.msk.bf16.mxu0 %vm431_vm0, %v430_v0  ;;  %325 = vmatpush3.bf16.msra.mxu1 %v349_v5  ;;  %p401_p10 = scmp.ne.s32.totalorder %s285_s6, %s400_s20  ;;  %p406_p12 = scmp.lt.s32.totalorder %s400_s20, %s400_s20 }
  0x22   :  { %331 = vmatpush3.bf16.msra.mxu0 %v350_v16 }
  0x23   :  { %332 = vmatprep.subr.bf16.mxu0 %v430_v0  ;;  %p407_p13 = por %p406_p12, %p405_p11 }
  0x25   :  { %p408_p0 = pnand %p407_p13, %p401_p10 }
  0x26   :  { %333 = vmatpush3.bf16.msra.mxu0 %v351_v17 }
  0xe0   :  { %v111_v7 = vpop.f32.mrf.mxu0 }
  0xe1   :  { %v112_v9 = vadd.f32 %v297_v6, %v111_v7 }
  0xe2   :  { %v320_v8 = vpop.f32.mrf.mxu0 }
  0xe3   :  { %v118_v13 = vmax.f32 %v112_v9, 0.0 }
  0xe4   :  { %v114_v10 = vpop.f32.mrf.mxu0 }
  0xe5   :  { %v115_v11 = vadd.f32 %v297_v6, %v114_v10 }
  0xe6   :  { %v321_v12 = vpop.f32.mrf.mxu0 }
  0xe7   :  { %v119_v14 = vmax.f32 %v115_v11, 0.0 }
  0xe9   :  { %v120_v15 = vpack.c.bf16 %v119_v14, %v118_v13 }
  0xeb   :  { %327 = vmatmul.mubr.msk.bf16.vlgmr.msra.gmra.mxu1 %vm144_vm3, %v120_v15 }
 0x1ab   :  { %v182_v19 = vpop.f32.mrf.mxu1 }
 0x1ac   :  { %v183_v21 = vadd.f32 %v300_v18, %v182_v19 }
 0x1ad   :  { %v328_v20 = vpop.f32.mrf.mxu1 }
 0x1ae   :  { %v189_v25 = vmax.f32 %v183_v21, 0.0 }
 0x1af   :  { %v185_v22 = vpop.f32.mrf.mxu1 }
 0x1b0   :  { %v186_v23 = vadd.f32 %v300_v18, %v185_v22 }
 0x1b1   :  { %v329_v24 = vpop.f32.mrf.mxu1 }
 0x1b2   :  { %v190_v26 = vmax.f32 %v186_v23, 0.0 }
 0x1b4   :  { %v191_v27 = vpack.c.bf16 %v190_v26, %v189_v25 }
 0x1b6   :  { %335 = vmatmul.mubr.msk.bf16.vlgmr.msra.gmra.mxu0 %vm144_vm3, %v191_v27 }
 0x276   :  { %v252_v29 = vpop.f32.mrf.mxu0 }
 0x277   :  { %v253_v30 = vadd.f32 %v304_v28, %v252_v29 }
 0x278   :  { %v336_v31 = vpop.f32.mrf.mxu0 }
 0x279   :  { %259 = vmax.xlane.f32.xlu0 %v253_v30 }
 0x27a   :  { %v255_v32 = vpop.f32.mrf.mxu0 }
 0x27b   :  { %v256_v33 = vadd.f32 %v304_v28, %v255_v32 }
 0x27c   :  { %v337_v34 = vpop.f32.mrf.mxu0 }
 0x27d   :  { %261 = vmax.xlane.f32.xlu0 %v256_v33 }
 0x302   :  { %v260_v35 = vpop.xlane.xlu0 %259 }
 0x303   :  { %v263_v36 = vsub.f32 %v253_v30, %v260_v35 }
 0x305   :  { %v265_v37 = vmul.f32 1.442695, %v263_v36 }
 0x306   :  { %v262_v38 = vpop.xlane.xlu0 %261 }
 0x307   :  { %352 = vpow2.f32 %v265_v37  ;;  %v264_v39 = vsub.f32 %v256_v33, %v262_v38 }
 0x309   :  { %v267_v40 = vmul.f32 1.442695, %v264_v39 }
 0x30b   :  { %354 = vpow2.f32 %v267_v40 }
 0x314   :  { %v353_v41 = vpop.eup %352 }
 0x315   :  { %269 = vadd.xlane.f32.xlu1 %v353_v41 }
 0x318   :  { %v355_v42 = vpop.eup %354 }
 0x319   :  { %271 = vadd.xlane.f32.xlu1 %v355_v42 }
 0x39e   :  { %v270_v43 = vpop.xlane.xlu1 %269 }
 0x39f   :  { %356 = vrcp.f32 %v270_v43 }
 0x3a2   :  { %v272_v44 = vpop.xlane.xlu1 %271 }
 0x3a3   :  { %358 = vrcp.f32 %v272_v44 }
 0x3ac   :  { %v357_v45 = vpop.eup %356 }
 0x3ad   :  { %v275_v46 = vmul.f32 %v357_v45, %v353_v41 }
 0x3af   :  { %277 = vst [vmem:[#allocation7] sm:$0xff] %v275_v46 }
 0x3b0   :  { %v359_v47 = vpop.eup %358 }
 0x3b1   :  { %v276_v48 = vmul.f32 %v359_v47, %v355_v42 }
 0x3b3   :  { %278 = vst [vmem:[#allocation7 + $0x8] sm:$0xff] %v276_v48 }
 0x3b4   :  { %411 = shalt.err (!%p408_p0)
}
 0x3b5   :  { %s433_s21 = smov 128   ;;  %s434_s22 = smov 8  }
 0x3b6   :  { %290 = dma.vmem_to_hbm [thread:$0]  %s285_s6, 256, %s511_s7, [#allocation4], %s433_s21, %s433_s21, %s434_s22  }
 0x3b7   :  { %424 = dma.done.wait [#allocation4], 256  }
 0x3b8   :  { %425 = vsyncadd [#allocation4], 4294967040 }
 0x3b9   :  { %294 = vsyncpa [#allocation3], 1 }
 0x3ba   :  { %295 = vsyncpa [#allocation6], 1 }
 0x3bb   :  { %296 = vsyncpa [#allocation4], 1 }

</bundles_post_ra>
